<compile_context>
chip_gen: v7x
topology: tpu7x:2x2x1
jax: 0.10.0
libtpu: 0.0.40
codegen_flags: <defaults>
</compile_context>

<pallas_src>
import functools
import math

import jax
import jax.numpy as jnp
from jax import lax
from jax.experimental import pallas as pl
from jax.experimental.pallas import tpu as pltpu


def _round_up(v, m):
    return ((v + m - 1) // m) * m


def _vmem_capacity_bytes():
    """Per-core VMEM capacity; conservative (v7x) fallback if query fails."""
    try:
        return int(pltpu.get_tpu_info().vmem_capacity_bytes)
    except Exception:
        return 64 * 1024 * 1024


def _downsample_kernel(xm_ref, xh_ref, w_ref, b_ref, o_ref, *, TH, WO, C):
    # xm_ref: (1, TH, 2, Wh_pad, 2C) bf16   parity rows [t*TH, t*TH + TH)
    # xh_ref: (1, 1,  2, Wh_pad, 2C) bf16   halo parity row (t+1)*TH
    # w_ref : (3, 2, 2C, C)          bf16   folded weights (kh, j-offset, 2C, C)
    # b_ref : (1, C)                 f32    bias
    # o_ref : (1, C, TH*WO)          bf16   output rows [t*TH, (t+1)*TH) x WO
    rows = TH * WO
    K2 = 2 * C

    # Bias + taps kh in {0, 1}: every output row reads a parity row inside the
    # main block (local row r, parity kh).  The kw taps are folded into two
    # K=2C matmuls per kh (j-offset 0 covers kw=0,1; j-offset 1 covers kw=2
    # with zero-padded weights).  Accumulate in f32.
    acc = jnp.broadcast_to(b_ref[...], (rows, C)).astype(jnp.float32)
    for kh in range(2):
        for jw in range(2):
            patch = xm_ref[0, pl.ds(0, TH), kh, pl.ds(jw, WO), :]
            acc = acc + jnp.dot(
                patch.reshape(rows, K2), w_ref[kh, jw],
                preferred_element_type=jnp.float32)

    # Tap kh == 2 reads parity row (oh + 1, parity 0): output rows [0, TH-1)
    # come from the main block shifted one parity row; the last output row of
    # the tile comes from the 1-row halo block.  Both contributions stay in
    # the accumulator (no o_ref read-modify-write).
    hi_c = None
    lo_c = None
    for jw in range(2):
        w_tap = w_ref[2, jw]
        lo = xh_ref[0, 0, 0, pl.ds(jw, WO), :]
        d_lo = jnp.dot(lo, w_tap, preferred_element_type=jnp.float32)
        lo_c = d_lo if lo_c is None else lo_c + d_lo
        if TH > 1:
            hi = xm_ref[0, pl.ds(1, TH - 1), 0, pl.ds(jw, WO), :]
            d_hi = jnp.dot(hi.reshape((TH - 1) * WO, K2), w_tap,
                           preferred_element_type=jnp.float32)
            hi_c = d_hi if hi_c is None else hi_c + d_hi
    if TH > 1:
        acc = acc + jnp.concatenate([hi_c, lo_c], axis=0)
    else:
        acc = acc + lo_c

    # Single lane-dense store: transpose (rows, C) -> (C, rows) on the XLU,
    # cast to bf16 at the store.
    o_ref[0] = acc.T.astype(o_ref.dtype)


def _block_bytes(TH, WO, Wh_pad, C):
    """Rough padded VMEM footprint of one grid step (double-buffered)."""
    rows = TH * WO
    lane_in = _round_up(2 * C, 128)
    main = TH * 2 * Wh_pad * lane_in * 2                       # bf16
    halo = 1 * 2 * Wh_pad * lane_in * 2                        # bf16
    out = _round_up(C, 16) * _round_up(rows, 128) * 2          # bf16
    wgt = 6 * _round_up(2 * C, 16) * _round_up(C, 128) * 2     # bf16
    bias = 8 * _round_up(C, 128) * 4                           # f32
    buffered = 2 * (main + halo + out + wgt + bias)
    scratch = 3 * _round_up(rows, 8) * _round_up(C, 128) * 4   # live f32 temps
    return buffered + scratch


def _valid_tile(d, HO, WO):
    """Tile-rows values whose output BlockSpec is lane-legal ((8,128) rule)."""
    if d <= 0 or HO % d != 0:
        return False
    if d == HO:
        return True                      # block == full flattened spatial dim
    return (d * WO) % 128 == 0           # lane-dim multiple of 128


def _choose_tile_rows(HO, WO, Wh_pad, C, budget_bytes, prefer_split):
    cands = [d for d in range(HO, 0, -1) if _valid_tile(d, HO, WO)]
    fitting = [d for d in cands if _block_bytes(d, WO, Wh_pad, C) <= budget_bytes]
    pool = fitting if fitting else [cands[-1]]
    if prefer_split and HO >= 2:
        split = [d for d in pool if d <= HO // 2]
        if split:
            return split[0]              # largest tile that still splits work
    return pool[0]


def downsample_pallas(x_nchw, w_khkwio, bias, *, tile_rows=None):
    """Equivalent of nn.Conv2d(C, C, kernel_size=3, stride=2, padding=1).

    Takes NCHW f32 (or bf16) input, returns NCHW bf16 output of shape
    (B, C, H//2, W//2).
    """
    B, C, H, W = x_nchw.shape
    assert H % 2 == 0 and W % 2 == 0, "even spatial dims expected (as the PyTorch module asserts)"
    HO, WO = H // 2, W // 2
    Hh, Wh = HO + 1, WO + 1              # (H+2)//2, (W+2)//2
    Wh_pad = _round_up(Wh, 8)            # sublane-aligned parity-row width

    # ---- input glue (one fused HBM pass) ----
    # NCHW -> NHWC, zero-pad (1 top/left, enough right to align Wh), cast
    # bf16.  The reshape below is bitcast-free:
    #   x3[b, i, ph, j, pw*C + c] == x_pad[b, 2i+ph, 2j+pw, c]
    # The extra right-pad columns (j >= Wh) are never read by the kernel.
    x_nhwc = jnp.transpose(x_nchw, (0, 2, 3, 1)).astype(jnp.bfloat16)
    x_pad = jnp.pad(x_nhwc, ((0, 0), (1, 1), (1, 1 + 2 * (Wh_pad - Wh)), (0, 0)))
    x3 = x_pad.reshape(B, Hh, 2, Wh_pad, 2 * C)

    # Fold the W-parity into the weights (would be done once at init in a
    # real model):  w_fold[kh, 0] = [w[kh,0]; w[kh,1]] (2C x C),
    #               w_fold[kh, 1] = [w[kh,2]; 0]       (2C x C).
    w_a = w_khkwio[:, 0:2, :, :].reshape(3, 2 * C, C)
    w_b = jnp.concatenate(
        [w_khkwio[:, 2, :, :], jnp.zeros((3, C, C), w_khkwio.dtype)], axis=1)
    w_fold = jnp.stack([w_a, w_b], axis=1).astype(jnp.bfloat16)   # (3,2,2C,C)
    b2d = bias.reshape(1, C).astype(jnp.float32)

    # ---- generation-aware tiling policy ----
    cap = _vmem_capacity_bytes()
    budget = cap // 3
    prefer_split = (B == 1)              # keep both v7x TensorCores busy
    if tile_rows is None:
        TH = _choose_tile_rows(HO, WO, Wh_pad, C, budget, prefer_split)
    else:
        TH = int(tile_rows)
        assert _valid_tile(TH, HO, WO), (
            "tile_rows must divide H//2 and give a lane-legal output block "
            "(tile_rows * (W//2) % 128 == 0, or tile_rows == H//2)")
        if _block_bytes(TH, WO, Wh_pad, C) > int(cap * 0.9):
            # Would not fit this generation's VMEM: shrink instead of failing.
            TH = _choose_tile_rows(HO, WO, Wh_pad, C, budget, prefer_split)
    n_t = HO // TH

    est = _block_bytes(TH, WO, Wh_pad, C)
    vmem_limit = min(int(cap * 0.9), max(2 * est, 48 * 1024 * 1024))

    kernel = functools.partial(_downsample_kernel, TH=TH, WO=WO, C=C)

    out_flat = pl.pallas_call(
        kernel,
        out_shape=jax.ShapeDtypeStruct((B, C, HO * WO), jnp.bfloat16),
        grid_spec=pltpu.PrefetchScalarGridSpec(
            num_scalar_prefetch=0,
            grid=(B, n_t),
            in_specs=[
                # main block: parity rows [t*TH, t*TH + TH)
                pl.BlockSpec((1, TH, 2, Wh_pad, 2 * C),
                             lambda b, t: (b, t, 0, 0, 0)),
                # halo block: the single parity row (t+1)*TH (same array)
                pl.BlockSpec((1, 1, 2, Wh_pad, 2 * C),
                             lambda b, t: (b, (t + 1) * TH, 0, 0, 0)),
                pl.BlockSpec((3, 2, 2 * C, C), lambda b, t: (0, 0, 0, 0)),
                pl.BlockSpec((1, C), lambda b, t: (0, 0)),
            ],
            out_specs=pl.BlockSpec((1, C, TH * WO), lambda b, t: (b, 0, t)),
        ),
        compiler_params=pltpu.CompilerParams(
            dimension_semantics=("parallel", "parallel"),
            vmem_limit_bytes=vmem_limit,
        ),
    )(x3, x3, w_fold, b2d)

    # Channel-major already: this reshape is free (no transpose pass).
    return out_flat.reshape(B, C, HO, WO)


if __name__ == "__main__":
    B, C, H, W = 2, 4, 16, 16

    key = jax.random.PRNGKey(0)
    kx, kw_, kb = jax.random.split(key, 3)

    x = jax.random.normal(kx, (B, C, H, W), jnp.float32)

    # Deterministic Conv2d-style init (uniform +/- 1/sqrt(fan_in)).
    fan_in = C * 3 * 3
    bound = 1.0 / math.sqrt(fan_in)
    w = jax.random.uniform(kw_, (3, 3, C, C), jnp.float32, -bound, bound)   # (kh, kw, Cin, Cout)
    b = jax.random.uniform(kb, (C,), jnp.float32, -bound, bound)

    def reference(x_in):
        # f32 XLA conv on bf16-rounded inputs (kernel multiplies in bf16,
        # accumulates f32, stores bf16 -> differences are rounding/order).
        x_r = x_in.astype(jnp.bfloat16).astype(jnp.float32)
        w_r = w.astype(jnp.bfloat16).astype(jnp.float32)
        w_oihw = jnp.transpose(w_r, (3, 2, 0, 1))
        return lax.conv_general_dilated(
            x_r, w_oihw, window_strides=(2, 2), padding=((1, 1), (1, 1)),
            dimension_numbers=("NCHW", "OIHW", "NCHW"),
            precision=lax.Precision.HIGHEST,
        ) + b[None, :, None, None]

    # 1) Small image, auto-chosen row tile (whole image per grid step).
    ds_auto = jax.jit(lambda xi: downsample_pallas(xi, w, b))
    y = jax.block_until_ready(ds_auto(x))
    assert y.shape == (B, C, H // 2, W // 2)
    assert jnp.allclose(y.astype(jnp.float32), reference(x), atol=3e-2, rtol=3e-2), \
        "auto-tile mismatch"

    # 2) Larger image with explicit row tiling (halo crosses tile boundaries,
    #    128-lane-multiple output blocks, 2x2 parallel grid).
    H2 = W2 = 32
    x2 = jax.random.normal(kx, (B, C, H2, W2), jnp.float32)
    ds_tiled = jax.jit(lambda xi: downsample_pallas(xi, w, b, tile_rows=8))
    y2 = jax.block_until_ready(ds_tiled(x2))
    assert y2.shape == (B, C, H2 // 2, W2 // 2)
    assert jnp.allclose(y2.astype(jnp.float32), reference(x2), atol=3e-2, rtol=3e-2), \
        "row-tiled mismatch"

    print("KERNEL_OK")
</pallas_src>

<mosaic_0001>
module attributes {stable_mosaic.version = 11 : i64} {
  func.func @_downsample_kernel(%arg0: i32, %arg1: i32, %arg2: memref<1x8x2x16x8xbf16, #tpu.memory_space<vmem>>, %arg3: memref<1x1x2x16x8xbf16, #tpu.memory_space<vmem>>, %arg4: memref<3x2x8x4xbf16, #tpu.memory_space<vmem>>, %arg5: memref<1x4xf32, #tpu.memory_space<vmem>>, %arg6: memref<1x4x64xbf16, #tpu.memory_space<vmem>>) attributes {dimension_semantics = [#tpu.dimension_semantics<parallel>, #tpu.dimension_semantics<parallel>], iteration_bounds = array<i64: 2, 1>, scalar_prefetch = 0 : i64, scratch_operands = 0 : i64, tpu.core_type = #tpu.core_type<tc>, window_params = [{transform_indices = @transform_0, window_bounds = array<i64: 1, 8, 2, 16, 8>}, {transform_indices = @transform_1, window_bounds = array<i64: 1, 1, 2, 16, 8>}, {pipeline_mode = #tpu.pipeline_mode<synchronous>, transform_indices = @transform_2, window_bounds = array<i64: 3, 2, 8, 4>}, {pipeline_mode = #tpu.pipeline_mode<synchronous>, transform_indices = @transform_3, window_bounds = array<i64: 1, 4>}, {transform_indices = @transform_4, window_bounds = array<i64: 1, 4, 64>}]} {
    %c0 = arith.constant 0 : index
    %c0_0 = arith.constant 0 : index
    %0 = vector.load %arg5[%c0, %c0_0] : memref<1x4xf32, #tpu.memory_space<vmem>>, vector<1x4xf32>
    %1 = vector.shape_cast %0 : vector<1x4xf32> to vector<1x4xf32>
    %2 = vector.broadcast %1 : vector<1x4xf32> to vector<64x4xf32>
    %c0_1 = arith.constant 0 : index
    %c0_2 = arith.constant 0 : index
    %c0_3 = arith.constant 0 : index
    %c0_4 = arith.constant 0 : index
    %c0_5 = arith.constant 0 : index
    %3 = vector.load %arg2[%c0_1, %c0_2, %c0_3, %c0_4, %c0_5] : memref<1x8x2x16x8xbf16, #tpu.memory_space<vmem>>, vector<1x8x1x8x8xbf16>
    %4 = vector.shape_cast %3 : vector<1x8x1x8x8xbf16> to vector<8x8x8xbf16>
    %5 = vector.shape_cast %4 : vector<8x8x8xbf16> to vector<64x8xbf16>
    %c0_6 = arith.constant 0 : index
    %c0_7 = arith.constant 0 : index
    %c0_8 = arith.constant 0 : index
    %c0_9 = arith.constant 0 : index
    %6 = vector.load %arg4[%c0_6, %c0_7, %c0_8, %c0_9] : memref<3x2x8x4xbf16, #tpu.memory_space<vmem>>, vector<1x1x8x4xbf16>
    %7 = vector.shape_cast %6 : vector<1x1x8x4xbf16> to vector<8x4xbf16>
    %cst = arith.constant dense<0.000000e+00> : vector<64x4xf32>
    %8 = tpu.matmul %5, %7, %cst {dimension_numbers = #tpu.dot_dimension_numbers<[1], [0], [0], [1], [0, 0, 1, 1], [], []>} : vector<64x8xbf16>, vector<8x4xbf16>, vector<64x4xf32> -> vector<64x4xf32>
    %9 = arith.addf %2, %8 : vector<64x4xf32>
    %c0_10 = arith.constant 0 : index
    %c0_11 = arith.constant 0 : index
    %c0_12 = arith.constant 0 : index
    %c1 = arith.constant 1 : index
    %c0_13 = arith.constant 0 : index
    %10 = vector.load %arg2[%c0_10, %c0_11, %c0_12, %c1, %c0_13] : memref<1x8x2x16x8xbf16, #tpu.memory_space<vmem>>, vector<1x8x1x8x8xbf16>
    %11 = vector.shape_cast %10 : vector<1x8x1x8x8xbf16> to vector<8x8x8xbf16>
    %12 = vector.shape_cast %11 : vector<8x8x8xbf16> to vector<64x8xbf16>
    %c0_14 = arith.constant 0 : index
    %c1_15 = arith.constant 1 : index
    %c0_16 = arith.constant 0 : index
    %c0_17 = arith.constant 0 : index
    %13 = vector.load %arg4[%c0_14, %c1_15, %c0_16, %c0_17] : memref<3x2x8x4xbf16, #tpu.memory_space<vmem>>, vector<1x1x8x4xbf16>
    %14 = vector.shape_cast %13 : vector<1x1x8x4xbf16> to vector<8x4xbf16>
    %cst_18 = arith.constant dense<0.000000e+00> : vector<64x4xf32>
    %15 = tpu.matmul %12, %14, %cst_18 {dimension_numbers = #tpu.dot_dimension_numbers<[1], [0], [0], [1], [0, 0, 1, 1], [], []>} : vector<64x8xbf16>, vector<8x4xbf16>, vector<64x4xf32> -> vector<64x4xf32>
    %16 = arith.addf %9, %15 : vector<64x4xf32>
    %c0_19 = arith.constant 0 : index
    %c0_20 = arith.constant 0 : index
    %c1_21 = arith.constant 1 : index
    %c0_22 = arith.constant 0 : index
    %c0_23 = arith.constant 0 : index
    %17 = vector.load %arg2[%c0_19, %c0_20, %c1_21, %c0_22, %c0_23] : memref<1x8x2x16x8xbf16, #tpu.memory_space<vmem>>, vector<1x8x1x8x8xbf16>
    %18 = vector.shape_cast %17 : vector<1x8x1x8x8xbf16> to vector<8x8x8xbf16>
    %19 = vector.shape_cast %18 : vector<8x8x8xbf16> to vector<64x8xbf16>
    %c1_24 = arith.constant 1 : index
    %c0_25 = arith.constant 0 : index
    %c0_26 = arith.constant 0 : index
    %c0_27 = arith.constant 0 : index
    %20 = vector.load %arg4[%c1_24, %c0_25, %c0_26, %c0_27] : memref<3x2x8x4xbf16, #tpu.memory_space<vmem>>, vector<1x1x8x4xbf16>
    %21 = vector.shape_cast %20 : vector<1x1x8x4xbf16> to vector<8x4xbf16>
    %cst_28 = arith.constant dense<0.000000e+00> : vector<64x4xf32>
    %22 = tpu.matmul %19, %21, %cst_28 {dimension_numbers = #tpu.dot_dimension_numbers<[1], [0], [0], [1], [0, 0, 1, 1], [], []>} : vector<64x8xbf16>, vector<8x4xbf16>, vector<64x4xf32> -> vector<64x4xf32>
    %23 = arith.addf %16, %22 : vector<64x4xf32>
    %c0_29 = arith.constant 0 : index
    %c0_30 = arith.constant 0 : index
    %c1_31 = arith.constant 1 : index
    %c1_32 = arith.constant 1 : index
    %c0_33 = arith.constant 0 : index
    %24 = vector.load %arg2[%c0_29, %c0_30, %c1_31, %c1_32, %c0_33] : memref<1x8x2x16x8xbf16, #tpu.memory_space<vmem>>, vector<1x8x1x8x8xbf16>
    %25 = vector.shape_cast %24 : vector<1x8x1x8x8xbf16> to vector<8x8x8xbf16>
    %26 = vector.shape_cast %25 : vector<8x8x8xbf16> to vector<64x8xbf16>
    %c1_34 = arith.constant 1 : index
    %c1_35 = arith.constant 1 : index
    %c0_36 = arith.constant 0 : index
    %c0_37 = arith.constant 0 : index
    %27 = vector.load %arg4[%c1_34, %c1_35, %c0_36, %c0_37] : memref<3x2x8x4xbf16, #tpu.memory_space<vmem>>, vector<1x1x8x4xbf16>
    %28 = vector.shape_cast %27 : vector<1x1x8x4xbf16> to vector<8x4xbf16>
    %cst_38 = arith.constant dense<0.000000e+00> : vector<64x4xf32>
    %29 = tpu.matmul %26, %28, %cst_38 {dimension_numbers = #tpu.dot_dimension_numbers<[1], [0], [0], [1], [0, 0, 1, 1], [], []>} : vector<64x8xbf16>, vector<8x4xbf16>, vector<64x4xf32> -> vector<64x4xf32>
    %30 = arith.addf %23, %29 : vector<64x4xf32>
    %c2 = arith.constant 2 : index
    %c0_39 = arith.constant 0 : index
    %c0_40 = arith.constant 0 : index
    %c0_41 = arith.constant 0 : index
    %31 = vector.load %arg4[%c2, %c0_39, %c0_40, %c0_41] : memref<3x2x8x4xbf16, #tpu.memory_space<vmem>>, vector<1x1x8x4xbf16>
    %32 = vector.shape_cast %31 : vector<1x1x8x4xbf16> to vector<8x4xbf16>
    %c0_42 = arith.constant 0 : index
    %c0_43 = arith.constant 0 : index
    %c0_44 = arith.constant 0 : index
    %c0_45 = arith.constant 0 : index
    %c0_46 = arith.constant 0 : index
    %33 = vector.load %arg3[%c0_42, %c0_43, %c0_44, %c0_45, %c0_46] : memref<1x1x2x16x8xbf16, #tpu.memory_space<vmem>>, vector<1x1x1x8x8xbf16>
    %34 = vector.shape_cast %33 : vector<1x1x1x8x8xbf16> to vector<8x8xbf16>
    %cst_47 = arith.constant dense<0.000000e+00> : vector<8x4xf32>
    %35 = tpu.matmul %34, %32, %cst_47 {dimension_numbers = #tpu.dot_dimension_numbers<[1], [0], [0], [1], [0, 0, 1, 1], [], []>} : vector<8x8xbf16>, vector<8x4xbf16>, vector<8x4xf32> -> vector<8x4xf32>
    %c0_48 = arith.constant 0 : index
    %c1_49 = arith.constant 1 : index
    %c0_50 = arith.constant 0 : index
    %c0_51 = arith.constant 0 : index
    %c0_52 = arith.constant 0 : index
    %36 = vector.load %arg2[%c0_48, %c1_49, %c0_50, %c0_51, %c0_52] : memref<1x8x2x16x8xbf16, #tpu.memory_space<vmem>>, vector<1x7x1x8x8xbf16>
    %37 = vector.shape_cast %36 : vector<1x7x1x8x8xbf16> to vector<7x8x8xbf16>
    %38 = vector.shape_cast %37 : vector<7x8x8xbf16> to vector<56x8xbf16>
    %cst_53 = arith.constant dense<0.000000e+00> : vector<56x4xf32>
    %39 = tpu.matmul %38, %32, %cst_53 {dimension_numbers = #tpu.dot_dimension_numbers<[1], [0], [0], [1], [0, 0, 1, 1], [], []>} : vector<56x8xbf16>, vector<8x4xbf16>, vector<56x4xf32> -> vector<56x4xf32>
    %c2_54 = arith.constant 2 : index
    %c1_55 = arith.constant 1 : index
    %c0_56 = arith.constant 0 : index
    %c0_57 = arith.constant 0 : index
    %40 = vector.load %arg4[%c2_54, %c1_55, %c0_56, %c0_57] : memref<3x2x8x4xbf16, #tpu.memory_space<vmem>>, vector<1x1x8x4xbf16>
    %41 = vector.shape_cast %40 : vector<1x1x8x4xbf16> to vector<8x4xbf16>
    %c0_58 = arith.constant 0 : index
    %c0_59 = arith.constant 0 : index
    %c0_60 = arith.constant 0 : index
    %c1_61 = arith.constant 1 : index
    %c0_62 = arith.constant 0 : index
    %42 = vector.load %arg3[%c0_58, %c0_59, %c0_60, %c1_61, %c0_62] : memref<1x1x2x16x8xbf16, #tpu.memory_space<vmem>>, vector<1x1x1x8x8xbf16>
    %43 = vector.shape_cast %42 : vector<1x1x1x8x8xbf16> to vector<8x8xbf16>
    %cst_63 = arith.constant dense<0.000000e+00> : vector<8x4xf32>
    %44 = tpu.matmul %43, %41, %cst_63 {dimension_numbers = #tpu.dot_dimension_numbers<[1], [0], [0], [1], [0, 0, 1, 1], [], []>} : vector<8x8xbf16>, vector<8x4xbf16>, vector<8x4xf32> -> vector<8x4xf32>
    %45 = arith.addf %35, %44 : vector<8x4xf32>
    %c0_64 = arith.constant 0 : index
    %c1_65 = arith.constant 1 : index
    %c0_66 = arith.constant 0 : index
    %c1_67 = arith.constant 1 : index
    %c0_68 = arith.constant 0 : index
    %46 = vector.load %arg2[%c0_64, %c1_65, %c0_66, %c1_67, %c0_68] : memref<1x8x2x16x8xbf16, #tpu.memory_space<vmem>>, vector<1x7x1x8x8xbf16>
    %47 = vector.shape_cast %46 : vector<1x7x1x8x8xbf16> to vector<7x8x8xbf16>
    %48 = vector.shape_cast %47 : vector<7x8x8xbf16> to vector<56x8xbf16>
    %cst_69 = arith.constant dense<0.000000e+00> : vector<56x4xf32>
    %49 = tpu.matmul %48, %41, %cst_69 {dimension_numbers = #tpu.dot_dimension_numbers<[1], [0], [0], [1], [0, 0, 1, 1], [], []>} : vector<56x8xbf16>, vector<8x4xbf16>, vector<56x4xf32> -> vector<56x4xf32>
    %50 = arith.addf %39, %49 : vector<56x4xf32>
    %51 = tpu.concatenate %50, %45 in 0 : vector<56x4xf32>, vector<8x4xf32> -> vector<64x4xf32>
    %52 = arith.addf %30, %51 : vector<64x4xf32>
    %53 = tpu.transpose %52, [1, 0] : vector<64x4xf32> -> vector<4x64xf32>
    %54 = arith.truncf %53 : vector<4x64xf32> to vector<4x64xbf16>
    %c0_70 = arith.constant 0 : index
    %c0_71 = arith.constant 0 : index
    %c0_72 = arith.constant 0 : index
    %55 = vector.load %arg6[%c0_70, %c0_71, %c0_72] : memref<1x4x64xbf16, #tpu.memory_space<vmem>>, vector<1x4x64xbf16>
    %56 = vector.shape_cast %55 : vector<1x4x64xbf16> to vector<4x64xbf16>
    %57 = vector.shape_cast %54 : vector<4x64xbf16> to vector<1x4x64xbf16>
    tpu.vector_store %arg6[%c0_70, %c0_71, %c0_72], %57 {strides = array<i32>} : memref<1x4x64xbf16, #tpu.memory_space<vmem>>, vector<1x4x64xbf16>,
    return
  }
  func.func @transform_0(%arg0: i32, %arg1: i32) -> (i32, i32, i32, i32, i32) {
    %c0_i32 = arith.constant 0 : i32
    %c0_i32_0 = arith.constant 0 : i32
    %c0_i32_1 = arith.constant 0 : i32
    %c0_i32_2 = arith.constant 0 : i32
    return %arg0, %arg1, %c0_i32, %c0_i32_0, %c0_i32_1 : i32, i32, i32, i32, i32
  }
  func.func @transform_1(%arg0: i32, %arg1: i32) -> (i32, i32, i32, i32, i32) {
    %c1_i32 = arith.constant 1 : i32
    %0 = arith.addi %arg1, %c1_i32 : i32
    %c8_i32 = arith.constant 8 : i32
    %1 = arith.muli %0, %c8_i32 : i32
    %c0_i32 = arith.constant 0 : i32
    %c0_i32_0 = arith.constant 0 : i32
    %c0_i32_1 = arith.constant 0 : i32
    %c0_i32_2 = arith.constant 0 : i32
    return %arg0, %1, %c0_i32, %c0_i32_0, %c0_i32_1 : i32, i32, i32, i32, i32
  }
  func.func @transform_2(%arg0: i32, %arg1: i32) -> (i32, i32, i32, i32) {
    %c0_i32 = arith.constant 0 : i32
    %c0_i32_0 = arith.constant 0 : i32
    %c0_i32_1 = arith.constant 0 : i32
    %c0_i32_2 = arith.constant 0 : i32
    %c0_i32_3 = arith.constant 0 : i32
    return %c0_i32, %c0_i32_0, %c0_i32_1, %c0_i32_2 : i32, i32, i32, i32
  }
  func.func @transform_3(%arg0: i32, %arg1: i32) -> (i32, i32) {
    %c0_i32 = arith.constant 0 : i32
    %c0_i32_0 = arith.constant 0 : i32
    %c0_i32_1 = arith.constant 0 : i32
    return %c0_i32, %c0_i32_0 : i32, i32
  }
  func.func @transform_4(%arg0: i32, %arg1: i32) -> (i32, i32, i32) {
    %c0_i32 = arith.constant 0 : i32
    %c0_i32_0 = arith.constant 0 : i32
    return %arg0, %c0_i32, %arg1 : i32, i32, i32
  }
}

</mosaic_0001>

<bundles_post_ra>
// kernel: _lambda_.1
= control target key start
LH: loop header
LB: loop body
LE: loop exit
PB: predicated region body
PF: predicated region fallthrough
CT: control target
= control target key end

     0   :  { %s1947_s15 = smov 0   ;;  %s1949_s16 = smov 0   ;;  %s2179_s0 = inlined_call_operand.vmem [shape: bf16[2,9,2,16,8], index: 0, kind: input, shape index: {}, may-alias: {0,1}]   ;;  %s2180_s1 = inlined_call_operand.vmem [shape: bf16[2,9,2,16,8], index: 1, kind: input, shape index: {}, may-alias: {0,1}]   ;;  %s2181_s2 = inlined_call_operand.vmem [shape: bf16[3,2,8,4], index: 2, kind: input, shape index: {}]   ;;  %s2182_s3 = inlined_call_operand.vmem [shape: f32[1,4], index: 3, kind: input, shape index: {}]   ;;  %s2183_s4 = inlined_call_operand.vmem [shape: bf16[2,4,64], index: 4, kind: output, shape index: {}]  }
   0x1   :  { %s1951_s17 = smov 0  }
   0x2 LB: > { %s26_s18 = sadd.s32 1, %s1914_s16  ;;  %p1581_p0 = scmp.ge.s32.totalorder %s1918_s17, 1  ;;  %s1918_s17 = sphi %s1951_s17, %s14_s17   ;;  %s1914_s16 = sphi %s1949_s16, %s2187_s16   ;;  %s1910_s15 = sphi %s1947_s15, %s2186_s15  }
   0x3   : > { %p28_p1 = scmp.ge.s32.totalorder %s26_s18, 2  ;;  %p220_p2 = scmp.lt.s32.totalorder %s1918_s17, 3 }
   0x5   : > { %s2189_s18 = smov (%p28_p1, %s26_s18), 0  ;;  %p221_p3 = pnand %p1581_p0, %p220_p2 }
   0x6   : > { %vm363_vm0 = vcmask (!%p221_p3), 1043456   ;;  %v1611_v0 = vld [vmem:[%s2181_s2 + $0x8] sm:$0xf] (!%p221_p3)  ;;  %v329_v1 = vld [vmem:[%s2181_s2] sm:$0xf] (!%p221_p3)  ;;  %p277_p4 = scmp.lt.s32.totalorder (!%p221_p3), %s1910_s15, 1 }
   0x7   : > { %224 = sbr.rel (%p221_p3) target bundleno = 439 (0x1b7), region = 36  ;;  %1849 = vmatprep.subr.msk.bf16.mxu0 (!%p221_p3), %vm363_vm0, %v1611_v0  ;;  %1847 = vmatprep.subr.msk.bf16.mxu1 (!%p221_p3), %vm363_vm0, %v329_v1  ;;  %v1974_v2 = vsel (!%p221_p3), %vm363_vm0, %v1611_v0, 0  ;;  %v365_v3 = vsel (!%p221_p3), %vm363_vm0, %v329_v1, 0  ;;  %v1636_v4 = vld [vmem:[%s2181_s2 + $0xc] sm:$0xf] (!%p221_p3)  ;;  %vm350_vm1 = vcmask (!%p221_p3), 64512  }
   0x8   : > { %1746 = vmatpush3.bf16.msra.mxu0 (!%p221_p3), %v1974_v2  ;;  %1726 = vmatpush3.bf16.msra.mxu1 (!%p221_p3), %v365_v3  ;;  %v1594_v5 = vld [vmem:[%s2181_s2 + $0x4] sm:$0xf] (!%p221_p3)  ;;  %v947_v6 = vsel (!%p221_p3), %vm363_vm0, %v1636_v4, 0  ;;  %v1653_v9 = vld [vmem:[%s2181_s2 + $0x14] sm:$0xf] (!%p221_p3)  ;;  %vm1921_vm5 = vmmov (!%p221_p3), 0  }
   0x9   : > { %1851 = vmatprep.subr.msk.bf16.mxu0 (!%p221_p3), %vm363_vm0, %v1636_v4  ;;  %1848 = vmatprep.subr.msk.bf16.mxu1 (!%p221_p3), %vm363_vm0, %v1594_v5  ;;  %v598_v7 = vsel (!%p221_p3), %vm363_vm0, %v1594_v5, 0  ;;  %vm456_vm2 = vsmask.f32 (!%p221_p3), 3328  ;;  %vm457_vm3 = vsmask.f32 (!%p221_p3), 7440  ;;  %v2011_v14 = vsel (!%p221_p3), %vm363_vm0, %v1653_v9, 0 }
   0xa   : > { %vm2029_vm4 = vmor (!%p221_p3), %vm456_vm2, %vm457_vm3  ;;  %vm1474_vm6 = vcmask (!%p221_p3), 517120  }
   0xe   : > { %s2191_s15 = smov (!%p277_p4, %s1910_s15), 1 }
   0xf   : > { %s1854_s27 = smul.u32 144, %s2191_s15  ;;  %s1584_s19 = sshll.u32 %s2191_s15, 1 }
  0x10   : > { %s312_s22 = scalar_lea.vmem %s2183_s4, %s1584_s19 }
  0x11   : > { %s1994_s30 = scalar_lea.vmem %s2179_s0, %s1854_s27  ;;  %s1690_s9 = sadd.s32 128, %s1854_s27 }
  0x12   : > { %v1883_v8 = vld [vmem:[%s1994_s30] ss:$16 sps:$4 sm:$0xff]   ;;  %v1884_v10 = vld [vmem:[%s1994_s30 + $0x8] ss:$16 sps:$4 sm:$0xff]   ;;  %v1621_v17 = vld [vmem:[%s1994_s30 + $0xc] sm:$0x1]  ;;  %s303_s12 = scalar_lea.vmem %s2180_s1, %s1690_s9 }
  0x13   : > { %1727 = vmatprep.mubr.msk.bf16.mxu1 %vm350_vm1, %v1883_v8  ;;  %v1885_v11 = vld [vmem:[%s1994_s30 + $0x20] ss:$16 sps:$4 sm:$0xff]   ;;  %1747 = vmatprep.mubr.msk.bf16.mxu0 %vm350_vm1, %v1884_v10  ;;  %v1886_v12 = vld [vmem:[%s1994_s30 + $0x28] ss:$16 sps:$4 sm:$0xff]   ;;  %v1623_v19 = vld [vmem:[%s1994_s30 + $0x1c] sm:$0x1] }
  0x14   : > { %1728 = vmatmul.mubr.msk.bf16.vlgmr.msra.gmra.mrb[0].mxu1 %vm350_vm1, %v1885_v11  ;;  %v1887_v13 = vld [vmem:[%s1994_s30 + $0x40] ss:$16 sps:$4 sm:$0xff]   ;;  %1748 = vmatmul.mubr.msk.bf16.vlgmr.msra.gmra.mrb[0].mxu0 %vm350_vm1, %v1886_v12  ;;  %v1620_v16 = vld [vmem:[%s1994_s30 + $0x8] sm:$0xf]  ;;  %v1622_v18 = vld [vmem:[%s1994_s30 + $0x18] sm:$0xf] }
  0x15   : > { %1736 = vmatpush3.bf16.msra.mxu1 %v598_v7  ;;  %1756 = vmatpush3.bf16.msra.mxu0 %v947_v6  ;;  %v1888_v15 = vld [vmem:[%s1994_s30 + $0x60] ss:$16 sps:$4 sm:$0xff]   ;;  %v809_v20 = vshrl.u32 %v1620_v16, 16  ;;  %v812_v21 = vshll.u32 %v1620_v16, 16  ;;  %v818_v22 = vshll.u32 %v1621_v17, 16  ;;  %v823_v23 = vshrl.u32 %v1622_v18, 16 }
  0x16   : > { %1731 = vmatprep.mubr.msk.bf16.mxu1 %vm350_vm1, %v1887_v13  ;;  %1852 = vmatprep.subr.msk.bf16.mxu0 %vm363_vm0, %v1653_v9  ;;  %v826_v24 = vshll.u32 %v1622_v18, 16  ;;  %v832_v25 = vshll.u32 %v1623_v19, 16  ;;  %v1624_v26 = vld [vmem:[%s1994_s30 + $0x28] sm:$0xf]  ;;  %v1625_v27 = vld [vmem:[%s1994_s30 + $0x2c] sm:$0x1] }
  0x17   : > { %1850 = vmatprep.subr.msk.bf16.mxu1 %vm363_vm0, %v1611_v0  ;;  %v811_v28 = vrot.slane %v809_v20, 4  ;;  %v814_v29 = vrot.slane %v812_v21, 5  ;;  %v820_v30 = vrot.slane %v818_v22, 5  ;;  %v825_v31 = vrot.slane %v823_v23, 4  ;;  %v1626_v32 = vld [vmem:[%s1994_s30 + $0x38] sm:$0xf] }
  0x18   : > { %v828_v33 = vrot.slane %v826_v24, 5  ;;  %v834_v34 = vrot.slane %v832_v25, 5  ;;  %v1627_v35 = vld [vmem:[%s1994_s30 + $0x3c] sm:$0x1]  ;;  %v837_v36 = vshrl.u32 %v1624_v26, 16  ;;  %v840_v37 = vshll.u32 %v1624_v26, 16 }
  0x19   : > { %v815_v38 = vor.u32 %v814_v29, %v811_v28  ;;  %v846_v39 = vshll.u32 %v1625_v27, 16  ;;  %v851_v40 = vshrl.u32 %v1626_v32, 16  ;;  %v854_v41 = vshll.u32 %v1626_v32, 16  ;;  %v440_v42 = vld [vmem:[%s1994_s30] sm:$0xf] }
  0x1a   : > { %v829_v44 = vor.u32 %v828_v33, %v825_v31  ;;  %v839_v45 = vrot.slane %v837_v36, 4  ;;  %v842_v46 = vrot.slane %v840_v37, 5  ;;  %v860_v47 = vshll.u32 %v1627_v35, 16  ;;  %v441_v48 = vld [vmem:[%s1994_s30 + $0x4] sm:$0x1] }
  0x1b   : > { %v816_v49 = vrot.slane %v815_v38, 4  ;;  %v848_v50 = vrot.slane %v846_v39, 5  ;;  %v853_v51 = vrot.slane %v851_v40, 4  ;;  %v856_v52 = vrot.slane %v854_v41, 5  ;;  %v442_v53 = vld [vmem:[%s1994_s30 + $0x10] sm:$0xf] }
  0x1c   : > { %1732 = vmatmul.mubr.msk.bf16.gmra.mrb[4].mxu1 %vm350_vm1, %v1888_v15  ;;  %v830_v54 = vrot.slane %v829_v44, 4  ;;  %v843_v55 = vor.u32 %v842_v46, %v839_v45  ;;  %v862_v56 = vrot.slane %v860_v47, 5  ;;  %v460_v57 = vshrl.u32 %v440_v42, 16  ;;  %v443_v60 = vld [vmem:[%s1994_s30 + $0x14] sm:$0x1] }
  0x1d   : > { %v821_v58 = vsel %vm2029_vm4, %v816_v49, %v820_v30  ;;  %v857_v59 = vor.u32 %v856_v52, %v853_v51  ;;  %v463_v61 = vshll.u32 %v440_v42, 16  ;;  %v469_v62 = vshll.u32 %v441_v48, 16  ;;  %v444_v4 = vld [vmem:[%s1994_s30 + $0x20] sm:$0xf]  ;;  %v445_v9 = vld [vmem:[%s1994_s30 + $0x24] sm:$0x1] }
  0x1e   : > { %v835_v63 = vsel %vm2029_vm4, %v830_v54, %v834_v34  ;;  %v844_v0 = vrot.slane %v843_v55, 4  ;;  %v462_v1 = vrot.slane %v460_v57, 4  ;;  %v474_v3 = vshrl.u32 %v442_v53, 16  ;;  %v446_v15 = vld [vmem:[%s1994_s30 + $0x30] sm:$0xf] }
  0x1f   : > { %v1637_v5 = vcombine.low %v821_v58, %v835_v63  ;;  %v858_v6 = vrot.slane %v857_v59, 4  ;;  %v465_v7 = vrot.slane %v463_v61, 5  ;;  %v471_v8 = vrot.slane %v469_v62, 5  ;;  %v447_v18 = vld [vmem:[%s1994_s30 + $0x34] sm:$0x1] }
  0x20   : > { %v849_v10 = vsel %vm2029_vm4, %v844_v0, %v848_v50  ;;  %v476_v11 = vrot.slane %v474_v3, 4  ;;  %v477_v12 = vshll.u32 %v442_v53, 16  ;;  %v483_v13 = vshll.u32 %v443_v60, 16  ;;  %v2052_v21 = vld [vmem:[%s2181_s2 + $0x10] sm:$0xf] }
  0x21   : > { %1757 = vmatprep.mubr.msk.bf16.mxu0 %vm350_vm1, %v1637_v5  ;;  %v863_v16 = vsel %vm2029_vm4, %v858_v6, %v862_v56  ;;  %v466_v17 = vor.u32 %v465_v7, %v462_v1  ;;  %v488_v19 = vshrl.u32 %v444_v4, 16  ;;  %v491_v20 = vshll.u32 %v444_v4, 16  ;;  %v1628_v26 = vld [vmem:[%s1994_s30 + $0x48] sm:$0xf]  ;;  %v1629_v31 = vld [vmem:[%s1994_s30 + $0x4c] sm:$0x1] }
  0x22   : > { %v1638_v22 = vcombine.low %v849_v10, %v863_v16  ;;  %v479_v23 = vrot.slane %v477_v12, 5  ;;  %v485_v24 = vrot.slane %v483_v13, 5  ;;  %v497_v25 = vshll.u32 %v445_v9, 16  ;;  %v1630_v36 = vld [vmem:[%s1994_s30 + $0x58] sm:$0xf] }
  0x23   : > { %v467_v27 = vrot.slane %v466_v17, 4  ;;  %v490_v28 = vrot.slane %v488_v19, 4  ;;  %v493_v29 = vrot.slane %v491_v20, 5  ;;  %v502_v30 = vshrl.u32 %v446_v15, 16  ;;  %v1631_v45 = vld [vmem:[%s1994_s30 + $0x5c] sm:$0x1] }
  0x24   : > { %1758 = vmatmul.mubr.msk.bf16.vlgmr.msra.gmra.mrb[0].mxu0 %vm350_vm1, %v1638_v22  ;;  %v480_v32 = vor.u32 %v479_v23, %v476_v11  ;;  %v499_v33 = vrot.slane %v497_v25, 5  ;;  %v505_v34 = vshll.u32 %v446_v15, 16  ;;  %v511_v35 = vshll.u32 %v447_v18, 16  ;;  %v1632_v51 = vld [vmem:[%s1994_s30 + $0x68] sm:$0xf] }
  0x25   : > { %1778 = vmatpush3.bf16.msra.mxu0 %v2011_v14  ;;  %v472_v37 = vsel %vm2029_vm4, %v467_v27, %v471_v8  ;;  %v494_v38 = vor.u32 %v493_v29, %v490_v28  ;;  %v504_v39 = vrot.slane %v502_v30, 4  ;;  %v865_v40 = vshrl.u32 %v1628_v26, 16  ;;  %v1633_v56 = vld [vmem:[%s1994_s30 + $0x6c] sm:$0x1]  ;;  %v1634_v57 = vld [vmem:[%s1994_s30 + $0x78] sm:$0xf] }
  0x26   : > { %v481_v41 = vrot.slane %v480_v32, 4  ;;  %v507_v42 = vrot.slane %v505_v34, 5  ;;  %v513_v44 = vrot.slane %v511_v35, 5  ;;  %v868_v46 = vshll.u32 %v1628_v26, 16  ;;  %1853 = vmatprep.subr.msk.bf16.mxu0 %vm363_vm0, %v2052_v21  ;;  %v1635_v3 = vld [vmem:[%s1994_s30 + $0x7c] sm:$0x1] }
  0x27   : > { %v495_v47 = vrot.slane %v494_v38, 4  ;;  %v867_v48 = vrot.slane %v865_v40, 4  ;;  %v874_v49 = vshll.u32 %v1629_v31, 16  ;;  %v879_v50 = vshrl.u32 %v1630_v36, 16  ;;  %v448_v12 = vld [vmem:[%s1994_s30 + $0x40] sm:$0xf] }
  0x28   : > { %v486_v52 = vsel %vm2029_vm4, %v481_v41, %v485_v24  ;;  %v508_v53 = vor.u32 %v507_v42, %v504_v39  ;;  %v870_v54 = vrot.slane %v868_v46, 5  ;;  %v882_v55 = vshll.u32 %v1630_v36, 16  ;;  %v449_v13 = vld [vmem:[%s1994_s30 + $0x44] sm:$0x1]  ;;  %v450_v19 = vld [vmem:[%s1994_s30 + $0x50] sm:$0xf] }
  0x29   : > { %v1595_v58 = vcombine.low %v472_v37, %v486_v52  ;;  %v500_v59 = vsel %vm2029_vm4, %v495_v47, %v499_v33  ;;  %v876_v60 = vrot.slane %v874_v49, 5  ;;  %v881_v61 = vrot.slane %v879_v50, 4  ;;  %v451_v27 = vld [vmem:[%s1994_s30 + $0x54] sm:$0x1]  ;;  %v452_v34 = vld [vmem:[%s1994_s30 + $0x60] sm:$0xf] }
  0x2a   : > { %v509_v62 = vrot.slane %v508_v53, 4  ;;  %v871_v63 = vor.u32 %v870_v54, %v867_v48  ;;  %v884_v0 = vrot.slane %v882_v55, 5  ;;  %v888_v1 = vshll.u32 %v1631_v45, 16  ;;  %v453_v39 = vld [vmem:[%s1994_s30 + $0x64] sm:$0x1] }
  0x2b   : > { %1737 = vmatprep.mubr.msk.bf16.mxu1 %vm350_vm1, %v1595_v58  ;;  %v893_v4 = vshrl.u32 %v1632_v51, 16  ;;  %v896_v5 = vshll.u32 %v1632_v51, 16  ;;  %v902_v6 = vshll.u32 %v1633_v56, 16  ;;  %v907_v7 = vshrl.u32 %v1634_v57, 16  ;;  %v454_v46 = vld [vmem:[%s1994_s30 + $0x70] sm:$0xf] }
  0x2c   : > { %v514_v8 = vsel %vm2029_vm4, %v509_v62, %v513_v44  ;;  %v872_v9 = vrot.slane %v871_v63, 4  ;;  %v885_v10 = vor.u32 %v884_v0, %v881_v61  ;;  %v890_v11 = vrot.slane %v888_v1, 5  ;;  %v455_v49 = vld [vmem:[%s1994_s30 + $0x74] sm:$0x1]  ;;  %v1894_v43 = vld [vmem:[%s1994_s30 + $0x50] ss:$16 sps:$4 sm:$0xff]  }
  0x2d   : > { %v1596_v15 = vcombine.low %v500_v59, %v514_v8  ;;  %v895_v16 = vrot.slane %v893_v4, 4  ;;  %v898_v17 = vrot.slane %v896_v5, 5  ;;  %v904_v18 = vrot.slane %v902_v6, 5  ;;  %v1657_v59 = vld [vmem:[%s1994_s30 + $0x10] sm:$0xf] }
  0x2e   : > { %v877_v20 = vsel %vm2029_vm4, %v872_v9, %v876_v60  ;;  %v886_v22 = vrot.slane %v885_v10, 4  ;;  %v909_v23 = vrot.slane %v907_v7, 4  ;;  %v910_v24 = vshll.u32 %v1634_v57, 16  ;;  %v1658_v0 = vld [vmem:[%s1994_s30 + $0x14] sm:$0x1] }
  0x2f   : > { %1738 = vmatmul.mubr.msk.bf16.vlgmr.msra.gmra.mrb[0].mxu1 %vm350_vm1, %v1596_v15  ;;  %v899_v25 = vor.u32 %v898_v17, %v895_v16  ;;  %v916_v26 = vshll.u32 %v1635_v3, 16  ;;  %v516_v28 = vshrl.u32 %v448_v12, 16  ;;  %v519_v29 = vshll.u32 %v448_v12, 16  ;;  %v1659_v6 = vld [vmem:[%s1994_s30 + $0x20] sm:$0xf] }
  0x30   : > { %v891_v30 = vsel %vm2029_vm4, %v886_v22, %v890_v11  ;;  %v912_v31 = vrot.slane %v910_v24, 5  ;;  %v525_v32 = vshll.u32 %v449_v13, 16  ;;  %v530_v33 = vshrl.u32 %v450_v19, 16  ;;  %1798 = vmatpush3.bf16.msra.mxu1 %v1974_v2  ;;  %v1660_v10 = vld [vmem:[%s1994_s30 + $0x24] sm:$0x1] }
  0x31   : > { %v1639_v35 = vcombine.low %v877_v20, %v891_v30  ;;  %v900_v36 = vrot.slane %v899_v25, 4  ;;  %v918_v37 = vrot.slane %v916_v26, 5  ;;  %v518_v38 = vrot.slane %v516_v28, 4  ;;  %v1661_v22 = vld [vmem:[%s1994_s30 + $0x30] sm:$0xf] }
  0x32   : > { %v1920_v40 = vmov 0.0   ;;  %v913_v41 = vor.u32 %v912_v31, %v909_v23  ;;  %v521_v42 = vrot.slane %v519_v29, 5  ;;  %v527_v44 = vrot.slane %v525_v32, 5  ;;  %v1663_v28 = vld [vmem:[%s1994_s30 + $0x40] sm:$0xf] }
  0x33   : > { %1765 = vmatprep.subr.bf16.mxu1 %v1920_v40  ;;  %v532_v45 = vrot.slane %v530_v33, 4  ;;  %1761 = vmatprep.mubr.msk.bf16.mxu0 %vm350_vm1, %v1639_v35  ;;  %v905_v2 = vsel %vm2029_vm4, %v900_v36, %v904_v18  ;;  %v533_v47 = vshll.u32 %v450_v19, 16  ;;  %v539_v48 = vshll.u32 %v451_v27, 16  ;;  %v1662_v27 = vld [vmem:[%s1994_s30 + $0x34] sm:$0x1] }
  0x34   : > { %v544_v50 = vshrl.u32 %v452_v34, 16  ;;  %v914_v51 = vrot.slane %v913_v41, 4  ;;  %v522_v52 = vor.u32 %v521_v42, %v518_v38  ;;  %v547_v53 = vshll.u32 %v452_v34, 16  ;;  %v1664_v33 = vld [vmem:[%s1994_s30 + $0x44] sm:$0x1] }
  0x35   : > { %v553_v54 = vshll.u32 %v453_v39, 16  ;;  %v535_v55 = vrot.slane %v533_v47, 5  ;;  %v541_v56 = vrot.slane %v539_v48, 5  ;;  %v558_v58 = vshrl.u32 %v454_v46, 16  ;;  %v1889_v38 = vld [vmem:[%s1994_s30 + $0x48] ss:$16 sps:$4 sm:$0xff]  }
  0x36   : > { %v546_v57 = vrot.slane %v544_v50, 4  ;;  %v919_v60 = vsel %vm2029_vm4, %v914_v51, %v918_v37  ;;  %v523_v61 = vrot.slane %v522_v52, 4  ;;  %v549_v62 = vrot.slane %v547_v53, 5  ;;  %v1665_v39 = vld [vmem:[%s1994_s30 + $0x50] sm:$0xf] }
  0x37   : > { %v555_v63 = vrot.slane %v553_v54, 5  ;;  %v1640_v1 = vcombine.low %v905_v2, %v919_v60  ;;  %v536_v3 = vor.u32 %v535_v55, %v532_v45  ;;  %v560_v4 = vrot.slane %v558_v58, 4  ;;  %v1667_v50 = vld [vmem:[%s1994_s30 + $0x60] sm:$0xf] }
  0x38   : > { %v561_v5 = vshll.u32 %v454_v46, 16  ;;  %v528_v7 = vsel %vm2029_vm4, %v523_v61, %v527_v44  ;;  %v550_v8 = vor.u32 %v549_v62, %v546_v57  ;;  %v567_v9 = vshll.u32 %v455_v49, 16  ;;  %v1666_v46 = vld [vmem:[%s1994_s30 + $0x54] sm:$0x1] }
  0x39   : > { %v1155_v11 = vshrl.u32 %v1657_v59, 16  ;;  %1762 = vmatmul.mubr.msk.bf16.gmra.mrb[4].mxu0 %vm350_vm1, %v1640_v1  ;;  %v537_v12 = vrot.slane %v536_v3, 4  ;;  %v1158_v15 = vshll.u32 %v1657_v59, 16  ;;  %v1164_v16 = vshll.u32 %v1658_v0, 16  ;;  %v1668_v59 = vld [vmem:[%s1994_s30 + $0x64] sm:$0x1] }
  0x3a   : > { %v563_v13 = vrot.slane %v561_v5, 5  ;;  %v551_v17 = vrot.slane %v550_v8, 4  ;;  %v569_v18 = vrot.slane %v567_v9, 5  ;;  %v1169_v20 = vshrl.u32 %v1659_v6, 16  ;;  %v1669_v0 = vld [vmem:[%s1994_s30 + $0x70] sm:$0xf] }
  0x3b   : > { %v1157_v19 = vrot.slane %v1155_v11, 4  ;;  %v542_v23 = vsel %vm2029_vm4, %v537_v12, %v541_v56  ;;  %v1160_v25 = vrot.slane %v1158_v15, 5  ;;  %v1166_v26 = vrot.slane %v1164_v16, 5  ;;  %v1670_v1 = vld [vmem:[%s1994_s30 + $0x74] sm:$0x1] }
  0x3c   : > { %v564_v24 = vor.u32 %v563_v13, %v560_v4  ;;  %v1597_v29 = vcombine.low %v528_v7, %v542_v23  ;;  %v556_v30 = vsel %vm2029_vm4, %v551_v17, %v555_v63  ;;  %v1171_v31 = vrot.slane %v1169_v20, 4  ;;  %v1035_v16 = vld [vmem:[%s303_s12 + $0x4] sm:$0x1] }
  0x3d   : > { %v1172_v32 = vshll.u32 %v1659_v6, 16  ;;  %v1161_v35 = vor.u32 %v1160_v25, %v1157_v19  ;;  %v1178_v36 = vshll.u32 %v1660_v10, 16  ;;  %v1183_v37 = vshrl.u32 %v1661_v22, 16  ;;  %v1024_v10 = vld [vmem:[%s303_s12] sm:$0xf] }
  0x3e   : > { %v565_v34 = vrot.slane %v564_v24, 4  ;;  %1741 = vmatprep.mubr.msk.bf16.mxu1 %vm350_vm1, %v1597_v29  ;;  %v1186_v42 = vshll.u32 %v1661_v22, 16  ;;  %v1192_v44 = vshll.u32 %v1662_v27, 16  ;;  %v1197_v45 = vshrl.u32 %v1663_v28, 16 }
  0x3f   : > { %v1174_v41 = vrot.slane %v1172_v32, 5  ;;  %v1162_v47 = vrot.slane %v1161_v35, 4  ;;  %v1180_v48 = vrot.slane %v1178_v36, 5  ;;  %v1185_v49 = vrot.slane %v1183_v37, 4  ;;  %v1890_v37 = vld [vmem:[%s1994_s30 + $0x68] ss:$16 sps:$4 sm:$0xff]  }
  0x40   : > { %v570_v2 = vsel %vm2029_vm4, %v565_v34, %v569_v18  ;;  %v1188_v53 = vrot.slane %v1186_v42, 5  ;;  %v1194_v54 = vrot.slane %v1192_v44, 5  ;;  %v1199_v56 = vrot.slane %v1197_v45, 4 }
  0x41   : > { %v1598_v51 = vcombine.low %v556_v30, %v570_v2  ;;  %v1175_v52 = vor.u32 %v1174_v41, %v1171_v31  ;;  %v1167_v55 = vsel %vm2029_vm4, %v1162_v47, %v1166_v26  ;;  %v1200_v57 = vshll.u32 %v1663_v28, 16 }
  0x42   : > { %v1206_v58 = vshll.u32 %v1664_v33, 16  ;;  %v1189_v61 = vor.u32 %v1188_v53, %v1185_v49  ;;  %v1211_v62 = vshrl.u32 %v1665_v39, 16  ;;  %v1214_v63 = vshll.u32 %v1665_v39, 16 }
  0x43   : > { %1742 = vmatmul.mubr.msk.bf16.gmra.mrb[4].mxu1 %vm350_vm1, %v1598_v51  ;;  %v1176_v60 = vrot.slane %v1175_v52, 4  ;;  %v1202_v3 = vrot.slane %v1200_v57, 5  ;;  %v1220_v4 = vshll.u32 %v1666_v46, 16  ;;  %v1225_v5 = vshrl.u32 %v1667_v50, 16  ;;  %v1895_v52 = vld [vmem:[%s1994_s30 + $0x70] ss:$0 sps:$4 sm:$0xff]  }
  0x44   : > { %1751 = vmatprep.mubr.msk.bf16.mxu1 %vm350_vm1, %v1889_v38  ;;  %v1190_v7 = vrot.slane %v1189_v61, 4  ;;  %v1213_v8 = vrot.slane %v1211_v62, 4  ;;  %v1216_v9 = vrot.slane %v1214_v63, 5  ;;  %v1208_v13 = vrot.slane %v1206_v58, 5 }
  0x45   : > { %v1181_v6 = vsel %vm2029_vm4, %v1176_v60, %v1180_v48  ;;  %v1203_v12 = vor.u32 %v1202_v3, %v1199_v56  ;;  %v1227_v15 = vrot.slane %v1225_v5, 4  ;;  %v1228_v19 = vshll.u32 %v1667_v50, 16  ;;  %v1891_v50 = vld [vmem:[%s1994_s30 + $0x10] ss:$16 sps:$4 sm:$0xff]  }
  0x46   : > { %v1671_v11 = vcombine.low %v1167_v55, %v1181_v6  ;;  %v1195_v17 = vsel %vm2029_vm4, %v1190_v7, %v1194_v54  ;;  %v1217_v18 = vor.u32 %v1216_v9, %v1213_v8  ;;  %v1234_v20 = vshll.u32 %v1668_v59, 16 }
  0x47   : > { %v1204_v22 = vrot.slane %v1203_v12, 4  ;;  %v1239_v23 = vshrl.u32 %v1669_v0, 16  ;;  %v1242_v24 = vshll.u32 %v1669_v0, 16  ;;  %v1248_v25 = vshll.u32 %v1670_v1, 16 }
  0x48   : > { %1779 = vmatprep.mubr.msk.bf16.mxu0 %vm350_vm1, %v1671_v11  ;;  %v1218_v26 = vrot.slane %v1217_v18, 4  ;;  %v1222_v27 = vrot.slane %v1220_v4, 5  ;;  %v1230_v28 = vrot.slane %v1228_v19, 5  ;;  %v1654_v29 = vcombine.low %v1024_v10, %v1035_v16 }
  0x49   : > { %v1209_v30 = vsel %vm2029_vm4, %v1204_v22, %v1208_v13  ;;  %v1241_v31 = vrot.slane %v1239_v23, 4  ;;  %v1244_v32 = vrot.slane %v1242_v24, 5  ;;  %v1098_v34 = vsel %vm363_vm0, %v2052_v21, 0 }
  0x4a   : > { %v1672_v33 = vcombine.low %v1195_v17, %v1209_v30  ;;  %v1231_v35 = vor.u32 %v1230_v28, %v1227_v15  ;;  %v1236_v36 = vrot.slane %v1234_v20, 5  ;;  %v1250_v39 = vrot.slane %v1248_v25, 5 }
  0x4b   : > { %v1245_v38 = vor.u32 %v1244_v32, %v1241_v31  ;;  %v1044_v41 = vshll.u32 %v1654_v29, 16  ;;  %v1223_v42 = vsel %vm2029_vm4, %v1218_v26, %v1222_v27  ;;  %v1042_v21 = vshrl.u32 %v1654_v29, 16 }
  0x4c   : > { %1780 = vmatmul.mubr.msk.bf16.vlgmr.msra.gmra.mrb[0].mxu0 %vm350_vm1, %v1672_v33  ;;  %v1232_v44 = vrot.slane %v1231_v35, 4 }
  0x4d   : > { %1788 = vmatpush3.bf16.msra.mxu0 %v1098_v34  ;;  %v1246_v45 = vrot.slane %v1245_v38, 4  ;;  %v1046_v2 = vrot.slane %v1044_v41, 1 }
  0x4e   : > { %v1237_v46 = vsel %vm2029_vm4, %v1232_v44, %v1236_v36 }
  0x4f   : > { %1752 = vmatmul.mubr.msk.bf16.vlgmr.msra.gmra.mrb[4].mxu1 %vm350_vm1, %v1890_v37  ;;  %v1673_v47 = vcombine.low %v1223_v42, %v1237_v46  ;;  %v1251_v48 = vsel %vm2029_vm4, %v1246_v45, %v1250_v39  ;;  %v1047_v51 = vor.u32 %v1046_v2, %v1042_v21 }
  0x50   : > { %1766 = vmatpush3.bf16.msra.mxu1 %v2011_v14  ;;  %1767 = vmatprep.mubr.msk.bf16.mxu1 %vm1921_vm5, %v1920_v40  ;;  %v1674_v49 = vcombine.low %v1251_v48, %v1251_v48  ;;  %v1893_v14 = vld [vmem:[%s1994_s30 + $0x30] ss:$16 sps:$4 sm:$0xff]  }
  0x51   : > { %1771 = vmatprep.subr.bf16.mxu1 %v1920_v40  ;;  %1783 = vmatprep.mubr.msk.bf16.mxu0 %vm350_vm1, %v1673_v47 }
  0x54   : > { %1784 = vmatmul.mubr.msk.bf16.gmra.mrb[8].mxu0 %vm350_vm1, %v1674_v49 }
  0x55   : > { %1789 = vmatprep.mubr.msk.bf16.mxu0 %vm350_vm1, %v1891_v50 }
  0x57   : > { %1768 = vmatmul.mubr.msk.bf16.vlgmr.msra.gmra.mrb[8].mxu1 %vm350_vm1, %v1047_v51 }
  0x58   : > { %1772 = vmatpush3.bf16.msra.mxu1 %v1098_v34  ;;  %1773 = vmatprep.mubr.msk.bf16.mxu1 %vm1921_vm5, %v1920_v40  ;;  %v1585_v40 = vld [vmem:[%s2182_s3] ss:$0 sm:$0xff] }
  0x5c   : > { %1790 = vmatmul.mubr.msk.bf16.vlgmr.msra.gmra.mrb[0].mxu0 %vm350_vm1, %v1893_v14 }
  0x5d   : > { %1793 = vmatprep.mubr.msk.bf16.mxu0 %vm350_vm1, %v1894_v43 }
  0x63   : > { %1774 = vmatmul.mubr.msk.bf16.vlgmr.msra.gmra.mrb[8].mxu1 %vm350_vm1, %v1024_v10 }
  0x64   : > { %1794 = vmatmul.mubr.msk.bf16.gmra.mrb[8].mxu0 %vm350_vm1, %v1895_v52 }
 0x102   : > { %v1739_v53 = vpop.f32.mrb[0].mxu1 }
 0x103   : > { %v634_v54 = vpop.f32.mrb[1].mxu1  ;;  %v1799_v10 = vadd.f32 %v1739_v53, %v1585_v40 }
 0x104   : > { %v1740_v55 = vpop.f32.mrb[2].mxu1  ;;  %v1801_v11 = vadd.f32 %v1585_v40, %v634_v54 }
 0x105   : > { %v637_v56 = vpop.f32.mrb[3].mxu1  ;;  %v1803_v13 = vadd.f32 %v1740_v55, %v1585_v40 }
 0x106   : > { %v1805_v17 = vadd.f32 %v1585_v40, %v637_v56 }
 0x10c   : > { %v1763_v57 = vpop.f32.mrb[4].mxu0 }
 0x10d   : > { %v999_v58 = vpop.f32.mrb[5].mxu0 }
 0x10e   : > { %v1764_v59 = vpop.f32.mrb[6].mxu0 }
 0x10f   : > { %v1002_v60 = vpop.f32.mrb[7].mxu0 }
 0x122   : > { %v1753_v61 = vpop.f32.mrb[4].mxu1 }
 0x123   : > { %v1807_v62 = vadd.f32 %v1753_v61, %v1585_v40  ;;  %v769_v63 = vpop.f32.mrb[5].mxu1 }
 0x124   : > { %v1809_v0 = vadd.f32 %v1585_v40, %v769_v63  ;;  %v1754_v1 = vpop.f32.mrb[6].mxu1 }
 0x125   : > { %v1811_v3 = vadd.f32 %v1754_v1, %v1585_v40  ;;  %v772_v4 = vpop.f32.mrb[7].mxu1  ;;  %v1808_v5 = vadd.f32 %v1807_v62, %v1763_v57 }
 0x126   : > { %v1813_v6 = vadd.f32 %v1585_v40, %v772_v4  ;;  %v1810_v7 = vadd.f32 %v1809_v0, %v999_v58 }
 0x127   : > { %v1812_v8 = vadd.f32 %v1811_v3, %v1764_v59 }
 0x128   : > { %v1814_v9 = vadd.f32 %v1813_v6, %v1002_v60 }
 0x12f   : > { %v1791_v12 = vpop.f32.mrb[0].mxu0 }
 0x130   : > { %v1800_v15 = vadd.f32 %v1799_v10, %v1791_v12  ;;  %v1403_v16 = vpop.f32.mrb[1].mxu0 }
 0x131   : > { %v1792_v18 = vpop.f32.mrb[2].mxu0  ;;  %v1802_v19 = vadd.f32 %v1801_v11, %v1403_v16 }
 0x132   : > { %v1804_v20 = vadd.f32 %v1803_v13, %v1792_v18  ;;  %v1406_v22 = vpop.f32.mrb[3].mxu0 }
 0x133   : > { %v1806_v23 = vadd.f32 %v1805_v17, %v1406_v22  ;;  %1441 = vxpose.xlu0.b32.start [1/8] (short) (narrow) %v1802_v19, 8 }
 0x136   : > { %v1134_v24 = vpop.f32.mrb[8].mxu1 }
 0x137   : > { %v1440_v25 = vadd.f32 %v1812_v8, %v1134_v24  ;;  %v1775_v26 = vpop.f32.mrb[9].mxu1  ;;  %v1795_v27 = vpop.f32.mrb[8].mxu0  ;;  %1442 = vxpose.xlu0.b32.cont [2/8] (short) (narrow) %v1806_v23, 8 }
 0x138   : > { %v1137_v28 = vpop.f32.mrb[10].mxu1  ;;  %v1439_v29 = vadd.f32 %v1808_v5, %v1795_v27  ;;  %v1419_v30 = vpop.f32.mrb[9].mxu0 }
 0x139   : > { %v1776_v31 = vpop.f32.mrb[11].mxu1  ;;  %v1437_v32 = vadd.f32 %v1810_v7, %v1419_v30  ;;  %v1796_v33 = vpop.f32.mrb[10].mxu0 }
 0x13a   : > { %v1422_v34 = vpop.f32.mrb[11].mxu0 }
 0x13b   : > { %v1438_v35 = vadd.f32 %v1814_v9, %v1422_v34  ;;  %1443 = vxpose.xlu0.b32.cont [3/8] (short) (narrow) %v1800_v15, 8 }
 0x13f   : > { %1444 = vxpose.xlu0.b32.cont [4/8] (short) (narrow) %v1804_v20, 8 }
 0x143   : > { %1445 = vxpose.xlu0.b32.cont [5/8] (short) (narrow) %v1437_v32, 8 }
 0x147   : > { %1446 = vxpose.xlu0.b32.cont [6/8] (short) (narrow) %v1438_v35, 8 }
 0x14b   : > { %1447 = vxpose.xlu0.b32.cont [7/8] (short) (narrow) %v1439_v29, 8 }
 0x14f   : > { %1448 = vxpose.xlu0.b32.end [8/8] (short) (narrow) %v1440_v25, 8 }
 0x1b3   : > { %v1457_v36 = vpop.trf.xlu0 }
 0x1b4   : > { %v1473_v37 = vpack.c.bf16 %v1457_v36, %v1457_v36 }
 0x1b6   : > { %1475 = vst.msk [vmem:[%s312_s22] sm:$0x3] %vm1474_vm6, %v1473_v37 }
 0x1b7 PF: > { %s14_s17 = sadd.s32 1, %s1918_s17   ;;  %s2186_s15 = smov %s1914_s16 }
 0x1b8   : > { %p11_p5 = scmp.ge.s32.totalorder %s14_s17, 4   ;;  %s2187_s16 = smov %s2189_s18 }
 0x1ba   :  { %13 = sbr.rel (!%p11_p5) target bundleno = 2 (0x2), region = 76 }

</bundles_post_ra>
